<compile_context>
chip_gen: v6e
topology: v6e:2x2x1
jax: 0.10.0
libtpu: 0.0.40
codegen_flags: <defaults>
</compile_context>

<pallas_src>
import functools

import jax
import jax.numpy as jnp
from jax.experimental import pallas as pl
from jax.experimental.pallas import tpu as pltpu


def _ca_block_kernel(x_ref, w1_ref, wh_ref, ww_ref, out_ref, *, h, w, bt):
    # x_ref:   (BT, C, H, W)  input tile (BT batch elements), native dtype
    # w1_ref:  (MIP, C)       conv_1x1 weight
    # wh_ref:  (C, MIP)       F_h weight
    # ww_ref:  (C, MIP)       F_w weight
    # out_ref: (BT, C, H, W)
    w1 = w1_ref[...].astype(jnp.float32)  # (MIP, C)
    wh = wh_ref[...].astype(jnp.float32)  # (C, MIP)
    ww = ww_ref[...].astype(jnp.float32)  # (C, MIP)

    for b in range(bt):  # static unroll over the batch tile
        x = x_ref[b]                      # (C, H, W)
        xf = x.astype(jnp.float32)        # accumulate pools/gates in f32

        # Coordinate pooling: W is the lane axis (XLU reduce), H the sublane axis.
        pool_h = jnp.mean(xf, axis=2)     # (C, H)  mean over W -> x_h
        pool_w = jnp.mean(xf, axis=1)     # (C, W)  mean over H -> x_w

        # Fused shared 1x1 conv (c -> mip) + ReLU over the concatenated map,
        # exactly matching cat([x_h, x_w], dim=2) in the reference.
        pool_cat = jnp.concatenate([pool_h, pool_w], axis=1)          # (C, H+W)
        y = jnp.maximum(
            jnp.dot(w1, pool_cat, preferred_element_type=jnp.float32), 0.0
        )                                                             # (MIP, H+W)

        # Per-coordinate gates (mip -> c) + sigmoid.
        s_h = jax.nn.sigmoid(
            jnp.dot(wh, y[:, :h], preferred_element_type=jnp.float32)
        )                                                             # (C, H)
        s_w = jax.nn.sigmoid(
            jnp.dot(ww, y[:, h:h + w], preferred_element_type=jnp.float32)
        )                                                             # (C, W)

        # out[c, hh, ww] = x[c, hh, ww] * s_h[c, hh] * s_w[c, ww]
        out_ref[b] = (xf * s_h[:, :, None] * s_w[:, None, :]).astype(out_ref.dtype)


def _choose_block_batch(n, c, h, w, itemsize):
    """Largest batch tile whose ~4 pipelined buffers fit a conservative VMEM budget,
    while keeping >= 2 grid steps when n >= 2 (so both v7x TensorCores are used)."""
    # Padded VMEM footprint of one image: H padded to 8 sublanes, W to 128 lanes.
    padded_h = -(-h // 8) * 8
    padded_w = -(-w // 128) * 128
    per_image = c * padded_h * padded_w * itemsize
    budget = 36 * 1024 * 1024            # for ~2 input + 2 output block buffers
    max_bt = max(1, budget // (4 * per_image))
    best = 1
    for bt in range(1, n + 1):
        if n % bt != 0 or bt > max_bt:
            continue
        if n // bt >= 2 or n == 1:       # keep the parallel grid >= 2 steps
            best = bt
    return best


def ca_block2d(x_nchw, w1, wh, ww):
    """Coordinate-attention forward, NCHW in / NCHW out (no layout glue).

    x_nchw: (N, C, H, W), any float dtype (f32 / bf16)
    w1: (MIP, C)  conv_1x1 weight (squeezed from (MIP, C, 1, 1))
    wh: (C, MIP)  F_h weight
    ww: (C, MIP)  F_w weight
    returns (N, C, H, W), same dtype as x
    """
    n, c, h, w = x_nchw.shape
    mip = w1.shape[0]
    dtype = x_nchw.dtype
    itemsize = jnp.dtype(dtype).itemsize

    bt = _choose_block_batch(n, c, h, w, itemsize)
    grid = (n // bt,)

    kernel = functools.partial(_ca_block_kernel, h=h, w=w, bt=bt)

    return pl.pallas_call(
        kernel,
        out_shape=jax.ShapeDtypeStruct((n, c, h, w), dtype),
        grid_spec=pltpu.PrefetchScalarGridSpec(
            num_scalar_prefetch=0,
            grid=grid,
            in_specs=[
                pl.BlockSpec((bt, c, h, w), lambda i: (i, 0, 0, 0)),
                pl.BlockSpec((mip, c), lambda i: (0, 0)),
                pl.BlockSpec((c, mip), lambda i: (0, 0)),
                pl.BlockSpec((c, mip), lambda i: (0, 0)),
            ],
            out_specs=pl.BlockSpec((bt, c, h, w), lambda i: (i, 0, 0, 0)),
        ),
        compiler_params=pltpu.CompilerParams(
            dimension_semantics=("parallel",),
            vmem_limit_bytes=48 * 1024 * 1024,
        ),
    )(x_nchw, w1, wh, ww)


def ca_block2d_ref(x, w1, wh, ww):
    """Plain-JAX reference mirroring the PyTorch forward (NCHW)."""
    n, c, h, w = x.shape
    xf = x.astype(jnp.float32)
    x_h = jnp.mean(xf, axis=3)                      # (n, c, h)
    x_w = jnp.mean(xf, axis=2)                      # (n, c, w)
    cat = jnp.concatenate([x_h, x_w], axis=2)       # (n, c, h+w)
    y = jnp.maximum(jnp.einsum("mc,ncl->nml", w1.astype(jnp.float32), cat), 0.0)
    y_h, y_w = y[:, :, :h], y[:, :, h:]
    s_h = jax.nn.sigmoid(jnp.einsum("cm,nml->ncl", wh.astype(jnp.float32), y_h))
    s_w = jax.nn.sigmoid(jnp.einsum("cm,nml->ncl", ww.astype(jnp.float32), y_w))
    return (xf * s_h[:, :, :, None] * s_w[:, :, None, :]).astype(x.dtype)


if __name__ == "__main__":
    # Small deterministic example: batch=2, channels=4, H=W=16.
    N, C, H, W = 2, 4, 16, 16
    reduction = 8
    MIP = max(8, C // reduction)

    key = jax.random.PRNGKey(0)
    kx, k1, k2, k3 = jax.random.split(key, 4)
    x = jax.random.normal(kx, (N, C, H, W), dtype=jnp.float32)
    # 1x1 conv weights (bias=False in the module): (out, in, 1, 1) squeezed.
    w1 = jax.random.normal(k1, (MIP, C), dtype=jnp.float32) * 0.2   # conv_1x1
    wh = jax.random.normal(k2, (C, MIP), dtype=jnp.float32) * 0.2   # F_h
    ww = jax.random.normal(k3, (C, MIP), dtype=jnp.float32) * 0.2   # F_w

    out = ca_block2d(x, w1, wh, ww)
    out = jax.block_until_ready(out)

    ref = ca_block2d_ref(x, w1, wh, ww)
    assert out.shape == (N, C, H, W)
    assert out.dtype == x.dtype
    assert jnp.allclose(out, ref, rtol=1e-5, atol=1e-5), "mismatch vs reference"

    print("KERNEL_OK")
</pallas_src>

<mosaic_0001>
module attributes {stable_mosaic.version = 11 : i64} {
  func.func @_ca_block_kernel(%arg0: i32, %arg1: memref<1x4x16x16xf32, #tpu.memory_space<vmem>>, %arg2: memref<8x4xf32, #tpu.memory_space<vmem>>, %arg3: memref<4x8xf32, #tpu.memory_space<vmem>>, %arg4: memref<4x8xf32, #tpu.memory_space<vmem>>, %arg5: memref<1x4x16x16xf32, #tpu.memory_space<vmem>>) attributes {dimension_semantics = [#tpu.dimension_semantics<parallel>], iteration_bounds = array<i64: 2>, scalar_prefetch = 0 : i64, scratch_operands = 0 : i64, tpu.core_type = #tpu.core_type<tc>, window_params = [{transform_indices = @transform_0, window_bounds = array<i64: 1, 4, 16, 16>}, {pipeline_mode = #tpu.pipeline_mode<synchronous>, transform_indices = @transform_1, window_bounds = array<i64: 8, 4>}, {pipeline_mode = #tpu.pipeline_mode<synchronous>, transform_indices = @transform_2, window_bounds = array<i64: 4, 8>}, {pipeline_mode = #tpu.pipeline_mode<synchronous>, transform_indices = @transform_3, window_bounds = array<i64: 4, 8>}, {transform_indices = @transform_4, window_bounds = array<i64: 1, 4, 16, 16>}]} {
    %c0 = arith.constant 0 : index
    %c0_0 = arith.constant 0 : index
    %0 = vector.load %arg2[%c0, %c0_0] : memref<8x4xf32, #tpu.memory_space<vmem>>, vector<8x4xf32>
    %c0_1 = arith.constant 0 : index
    %c0_2 = arith.constant 0 : index
    %1 = vector.load %arg3[%c0_1, %c0_2] : memref<4x8xf32, #tpu.memory_space<vmem>>, vector<4x8xf32>
    %c0_3 = arith.constant 0 : index
    %c0_4 = arith.constant 0 : index
    %2 = vector.load %arg4[%c0_3, %c0_4] : memref<4x8xf32, #tpu.memory_space<vmem>>, vector<4x8xf32>
    %c0_5 = arith.constant 0 : index
    %c0_6 = arith.constant 0 : index
    %c0_7 = arith.constant 0 : index
    %c0_8 = arith.constant 0 : index
    %3 = vector.load %arg1[%c0_5, %c0_6, %c0_7, %c0_8] : memref<1x4x16x16xf32, #tpu.memory_space<vmem>>, vector<1x4x16x16xf32>
    %4 = vector.shape_cast %3 : vector<1x4x16x16xf32> to vector<4x16x16xf32>
    %cst = arith.constant dense<0.000000e+00> : vector<4x16xf32>
    %5 = vector.multi_reduction <add>, %4, %cst [2] : vector<4x16x16xf32> to vector<4x16xf32>
    %cst_9 = arith.constant 1.600000e+01 : f32
    %6 = vector.broadcast %cst_9 : f32 to vector<4x16xf32>
    %7 = arith.divf %5, %6 : vector<4x16xf32>
    %cst_10 = arith.constant dense<0.000000e+00> : vector<4x16xf32>
    %8 = vector.multi_reduction <add>, %4, %cst_10 [1] : vector<4x16x16xf32> to vector<4x16xf32>
    %cst_11 = arith.constant 1.600000e+01 : f32
    %9 = vector.broadcast %cst_11 : f32 to vector<4x16xf32>
    %10 = arith.divf %8, %9 : vector<4x16xf32>
    %11 = tpu.concatenate %7, %10 in 1 : vector<4x16xf32>, vector<4x16xf32> -> vector<4x32xf32>
    %cst_12 = arith.constant dense<0.000000e+00> : vector<8x32xf32>
    %12 = tpu.matmul %0, %11, %cst_12 {dimension_numbers = #tpu.dot_dimension_numbers<[1], [0], [0], [1], [0, 0, 1, 1], [], []>} : vector<8x4xf32>, vector<4x32xf32>, vector<8x32xf32> -> vector<8x32xf32>
    %cst_13 = arith.constant 0.000000e+00 : f32
    %13 = vector.broadcast %cst_13 : f32 to vector<8x32xf32>
    %14 = arith.maximumf %12, %13 : vector<8x32xf32>
    %15 = vector.extract_strided_slice %14 {offsets = [0, 0], sizes = [8, 16], strides = [1, 1]} : vector<8x32xf32> to vector<8x16xf32>
    %cst_14 = arith.constant dense<0.000000e+00> : vector<4x16xf32>
    %16 = tpu.matmul %1, %15, %cst_14 {dimension_numbers = #tpu.dot_dimension_numbers<[1], [0], [0], [1], [0, 0, 1, 1], [], []>} : vector<4x8xf32>, vector<8x16xf32>, vector<4x16xf32> -> vector<4x16xf32>
    %17 = arith.negf %16 : vector<4x16xf32>
    %18 = math.exp %17 : vector<4x16xf32>
    %cst_15 = arith.constant 1.000000e+00 : f32
    %19 = vector.broadcast %cst_15 : f32 to vector<4x16xf32>
    %20 = arith.addf %19, %18 : vector<4x16xf32>
    %21 = arith.divf %19, %20 : vector<4x16xf32>
    %22 = vector.extract_strided_slice %14 {offsets = [0, 16], sizes = [8, 16], strides = [1, 1]} : vector<8x32xf32> to vector<8x16xf32>
    %cst_16 = arith.constant dense<0.000000e+00> : vector<4x16xf32>
    %23 = tpu.matmul %2, %22, %cst_16 {dimension_numbers = #tpu.dot_dimension_numbers<[1], [0], [0], [1], [0, 0, 1, 1], [], []>} : vector<4x8xf32>, vector<8x16xf32>, vector<4x16xf32> -> vector<4x16xf32>
    %24 = arith.negf %23 : vector<4x16xf32>
    %25 = math.exp %24 : vector<4x16xf32>
    %cst_17 = arith.constant 1.000000e+00 : f32
    %26 = vector.broadcast %cst_17 : f32 to vector<4x16xf32>
    %27 = arith.addf %26, %25 : vector<4x16xf32>
    %28 = arith.divf %26, %27 : vector<4x16xf32>
    %29 = vector.shape_cast %21 : vector<4x16xf32> to vector<4x16x1xf32>
    %30 = vector.broadcast %29 : vector<4x16x1xf32> to vector<4x16x16xf32>
    %31 = arith.mulf %4, %30 : vector<4x16x16xf32>
    %32 = vector.shape_cast %28 : vector<4x16xf32> to vector<4x1x16xf32>
    %33 = vector.broadcast %32 : vector<4x1x16xf32> to vector<4x16x16xf32>
    %34 = arith.mulf %31, %33 : vector<4x16x16xf32>
    %c0_18 = arith.constant 0 : index
    %c0_19 = arith.constant 0 : index
    %c0_20 = arith.constant 0 : index
    %c0_21 = arith.constant 0 : index
    %35 = vector.load %arg5[%c0_18, %c0_19, %c0_20, %c0_21] : memref<1x4x16x16xf32, #tpu.memory_space<vmem>>, vector<1x4x16x16xf32>
    %36 = vector.shape_cast %35 : vector<1x4x16x16xf32> to vector<4x16x16xf32>
    %37 = vector.shape_cast %34 : vector<4x16x16xf32> to vector<1x4x16x16xf32>
    tpu.vector_store %arg5[%c0_18, %c0_19, %c0_20, %c0_21], %37 {strides = array<i32>} : memref<1x4x16x16xf32, #tpu.memory_space<vmem>>, vector<1x4x16x16xf32>,
    return
  }
  func.func @transform_0(%arg0: i32) -> (i32, i32, i32, i32) {
    %c0_i32 = arith.constant 0 : i32
    %c0_i32_0 = arith.constant 0 : i32
    %c0_i32_1 = arith.constant 0 : i32
    %c0_i32_2 = arith.constant 0 : i32
    return %arg0, %c0_i32, %c0_i32_0, %c0_i32_1 : i32, i32, i32, i32
  }
  func.func @transform_1(%arg0: i32) -> (i32, i32) {
    %c0_i32 = arith.constant 0 : i32
    %c0_i32_0 = arith.constant 0 : i32
    %c0_i32_1 = arith.constant 0 : i32
    return %c0_i32, %c0_i32_0 : i32, i32
  }
  func.func @transform_2(%arg0: i32) -> (i32, i32) {
    %c0_i32 = arith.constant 0 : i32
    %c0_i32_0 = arith.constant 0 : i32
    %c0_i32_1 = arith.constant 0 : i32
    return %c0_i32, %c0_i32_0 : i32, i32
  }
  func.func @transform_3(%arg0: i32) -> (i32, i32) {
    %c0_i32 = arith.constant 0 : i32
    %c0_i32_0 = arith.constant 0 : i32
    %c0_i32_1 = arith.constant 0 : i32
    return %c0_i32, %c0_i32_0 : i32, i32
  }
  func.func @transform_4(%arg0: i32) -> (i32, i32, i32, i32) {
    %c0_i32 = arith.constant 0 : i32
    %c0_i32_0 = arith.constant 0 : i32
    %c0_i32_1 = arith.constant 0 : i32
    %c0_i32_2 = arith.constant 0 : i32
    return %arg0, %c0_i32, %c0_i32_0, %c0_i32_1 : i32, i32, i32, i32
  }
}

</mosaic_0001>

<bundles_post_ra>
// kernel: tpu_custom_call.1
= control target key start
LH: loop header
LB: loop body
LE: loop exit
PB: predicated region body
PF: predicated region fallthrough
CT: control target
= control target key end

     0   :  { %9 = vsyncpa [#allocation3], 0  ;;  %s1275_s0 = inlined_call_operand.hbm [shape: f32[2,4,16,16], index: 0, kind: input, shape index: {}]   ;;  %s1276_s1 = inlined_call_operand.vmem [shape: f32[8,4], index: 1, kind: input, shape index: {}]   ;;  %s1277_s2 = inlined_call_operand.vmem [shape: f32[4,8], index: 2, kind: input, shape index: {}]   ;;  %s1278_s3 = inlined_call_operand.vmem [shape: f32[4,8], index: 3, kind: input, shape index: {}]   ;;  %s1279_s4 = inlined_call_operand.hbm [shape: f32[2,4,16,16], index: 4, kind: output, shape index: {}]  }
   0x1   :  { %11 = vsyncpa [#allocation3 + $0x1], 0 }
   0x2   :  { %12 = vsyncpa [#allocation4], 0 }
   0x3   :  { %14 = vsyncpa [#allocation4 + $0x1], 0  ;;  %s1037_s15 = smov 0   ;;  %s1039_s16 = smov 0  }
   0x4   :  { %s1041_s17 = smov 0   ;;  %s1043_s18 = smov 0  }
   0x5 LB: > { %s1058_s19 = sadd.s32 4294967295, %s999_s18   ;;  %s801_s20 = sadd.s32 4294967294, %s999_s18   ;;  %s999_s18 = sphi %s1043_s18, %s1294_s18   ;;  %s995_s17 = sphi %s1041_s17, %s1293_s17   ;;  %s991_s16 = sphi %s1039_s16, %s1292_s16   ;;  %s987_s15 = sphi %s1037_s15, %s1291_s15  }
   0x6   : > { %s1062_s21 = sadd.s32 1, %s999_s18   ;;  %s27_s22 = sadd.s32 1, %s995_s17 }
   0x7   : > { %s24_s23 = ssub.s32 %s999_s18, %s1062_s21  ;;  %p34_p0 = scmp.ne.s32.totalorder %s995_s17, %s991_s16 }
   0x8   : > { %p25_p1 = scmp.eq.s32.totalorder %s24_s23, 0  ;;  %p35_p2 = scmp.eq.s32.totalorder %s999_s18, 0 }
   0x9   : > { %p40_p3 = scmp.ne.s32.totalorder %s991_s16, %s987_s15  ;;  %p41_p4 = scmp.eq.s32.totalorder %s1058_s19, 0 }
   0xa   : > { %s1074_s24 = scalar_select %p25_p1, %s995_s17, %s27_s22  }
   0xb   : > { %p1076_p5 = por %p35_p2, %p34_p0  ;;  %p1080_p6 = por %p41_p4, %p40_p3 }
   0xc   : > { %p127_p7 = scmp.eq.s32.totalorder %s1058_s19, 1  ;;  %p133_p8 = scmp.eq.s32.totalorder %s801_s20, 1 }
   0xd   : > { %s1283_s26 = scalar_select %p1080_p6, 1, 0 }
   0xe   : > { %p856_p10 = scmp.lt.s32.totalorder %s999_s18, 2  ;;  %p1087_p11 = por %p127_p7, %p34_p0 }
   0xf   : > { %p1091_p12 = por %p133_p8, %p40_p3  ;;  %s162_s29 = sand.u32 1, %s995_s17  }
  0x10   : > { %s1284_s27 = scalar_select %p1087_p11, 1, 0 }
  0x11   : > { %s1285_s28 = scalar_select %p1091_p12, 1, 0 }
  0x12   : > { %s821_s30 = sshll.u32 %s999_s18, 10  ;;  %s804_s5 = sshll.u32 %s162_s29, 6 }
  0x13   : > { %s1100_s8 = scalar_lea.hbm %s1275_s0, %s821_s30  ;;  %s166_s9 = scalar_lea.vmem [#allocation2], %s804_s5 }
  0x14   : > { %s173_s10 = sshll.u32 %s166_s9, 4  ;;  %p1104_p13 = pnand %p856_p10, %p1076_p5  ;;  %s1108_s10 = int_to_ptr.vmem [resolvable:$true] %s173_s10 }
  0x15   : > { %s1110_s12 = scalar_lea.sflag [#allocation3], %s162_s29  ;;  %s907_s13 = scalar_lea.hbm %s1100_s8, 1024 }
  0x16   : > { %p908_p0 = scmp.ne.s32.totalorder %s1100_s8, %s907_s13  ;;  %p909_p1 = pneg %p1104_p13 }
  0x17   : > { %s912_s22 = scalar_lea.hbm %s1275_s0, 2048  ;;  %p913_p4 = scmp.lt.s32.totalorder %s1100_s8, %s1275_s0 }
  0x18   : > { %p910_p2 = pnand %p909_p1, %p908_p0  ;;  %p914_p5 = scmp.lt.s32.totalorder %s912_s22, %s907_s13 }
  0x1a   : > { %p911_p3 = pneg %p910_p2  ;;  %p915_p7 = por %p914_p5, %p913_p4 }
  0x1c   : > { %p916_p8 = pnand %p915_p7, %p911_p3 }
  0x1e   : > { %919 = shalt.err (!%p916_p8)
}
  0x1f   : > { %s920_s29 = scalar_lea.vmem %s1108_s10, 1024  ;;  %s1001_s30 = smov [#allocation2]  }
  0x20   : > { %p921_p10 = scmp.ne.s32.totalorder %s1108_s10, %s920_s29  ;;  %s925_s5 = sshll.u32 %s1001_s30, 4  ;;  %s926_s5 = int_to_ptr.vmem [resolvable:$false] %s925_s5 }
  0x21   : > { %s927_s6 = scalar_lea.vmem %s926_s5, 2048  ;;  %p928_p2 = scmp.lt.s32.totalorder %s1108_s10, %s926_s5 }
  0x22   : > { %p923_p9 = pnand %p921_p10, %p909_p1  ;;  %p929_p12 = scmp.lt.s32.totalorder %s927_s6, %s920_s29 }
  0x24   : > { %p924_p0 = pneg %p923_p9  ;;  %p930_p11 = por %p929_p12, %p928_p2 }
  0x26   : > { %p931_p6 = pnand %p930_p11, %p924_p0 }
  0x28   : > { %934 = shalt.err (!%p931_p6)
}
  0x29   : > { %s1002_s7 = smov 128   ;;  %s1003_s9 = smov 8  }
  0x2a   : > { %851 = dma.hbm_to_vmem [thread:$0]  (!%p1104_p13), %s1100_s8, 1024, %s1108_s10, %s1110_s12, %s1002_s7, %s1002_s7, %s1003_s9  }
  0x2b   : > { %p807_p9 = scmp.ge.s32.totalorder %s999_s18, 1  ;;  %p181_p1 = scmp.lt.s32.totalorder %s999_s18, 3 }
  0x2d   : > { %p182_p3 = pnand %p807_p9, %p181_p1 }
  0x2e   : > { %s1134_s13 = sand.u32 (!%p182_p3), 1, %s991_s16   ;;  %p1287_p6 = scmp.ne.s32.totalorder (!%p182_p3), %s1283_s26, 0 }
  0x2f   : > { %185 = sbr.rel (%p182_p3) target bundleno = 785 (0x311), region = 36  ;;  %s808_s14 = sshll.u32 (!%p182_p3), %s1134_s13, 6 }
  0x30   : > { %s188_s20 = scalar_lea.sflag (!%p182_p3), [#allocation3], %s1134_s13  ;;  %s191_s22 = scalar_lea.vmem (!%p182_p3), [#allocation2], %s808_s14 }
  0x34   : > { %978 = dma.done.wait (%p1287_p6), %s188_s20, 1024  }
  0x35   : > { %980 = vsyncadd (%p1287_p6), %s188_s20, 4294966272  ;;  %vm227_vm0 = vcmask 130048   ;;  %v1144_v0 = vld [vmem:[%s191_s22 + $0x10] sm:$0xff]  ;;  %v1146_v1 = vld [vmem:[%s191_s22] sm:$0xff]  ;;  %vm341_vm1 = vcmask 1041409   ;;  %vm343_vm2 = vcmask 1042434   ;;  %v301_v52 = vlaneseq }
  0x36   : > { %v1148_v2 = vld [vmem:[%s191_s22 + $0x18] sm:$0xff]  ;;  %v234_v3 = vsel %vm227_vm0, %v1144_v0, 0.0  ;;  %v228_v4 = vsel %vm227_vm0, %v1146_v1, 0.0  ;;  %v1156_v6 = vld [vmem:[%s191_s22 + $0x8] sm:$0xff]  ;;  %v1160_v8 = vld [vmem:[%s191_s22 + $0x20] sm:$0xff]  ;;  %v1004_v48 = vmov 0.0  }
  0x37   : > { %v237_v5 = vsel %vm227_vm0, %v1148_v2, 0.0  ;;  %v1158_v7 = vld [vmem:[%s191_s22 + $0x28] sm:$0xff]  ;;  %235 = vadd.xlane.f32.xlu1 %v234_v3  ;;  %229 = vadd.xlane.f32.xlu0 %v228_v4  ;;  %v231_v10 = vsel %vm227_vm0, %v1156_v6, 0.0  ;;  %v240_v12 = vsel %vm227_vm0, %v1160_v8, 0.0  ;;  %v1168_v13 = vld [vmem:[%s191_s22 + $0x38] sm:$0xff]  ;;  %v1170_v14 = vld [vmem:[%s191_s22 + $0x30] sm:$0xff] }
  0x38   : > { %v268_v9 = vadd.f32 %v237_v5, %v234_v3  ;;  %v243_v11 = vsel %vm227_vm0, %v1158_v7, 0.0  ;;  %v261_v15 = vadd.f32 %v231_v10, %v228_v4  ;;  %v249_v17 = vsel %vm227_vm0, %v1168_v13, 0.0  ;;  %829 = vmatprep.subr.mxu0 %v1004_v48  ;;  %834 = vmatprep.subr.mxu1 %v1004_v48  ;;  %s1006_s26 = smov 16   ;;  %s1007_s23 = smov 112  }
  0x39   : > { %v275_v16 = vadd.f32 %v243_v11, %v240_v12  ;;  %v246_v18 = vsel %vm227_vm0, %v1170_v14, 0.0  ;;  %vm345_vm3 = vcmask 1043459   ;;  %vm1005_vm4 = vmmov 0   ;;  %s215_s30 = scalar_lea.vmem [#allocation5], %s808_s14  ;;  %s822_s5 = sshll.u32 %s1058_s19, 10 }
  0x3a   : > { %v269_v19 = vrot.slane %v268_v9, 4  ;;  %v282_v20 = vadd.f32 %v249_v17, %v246_v18  ;;  %v262_v21 = vrot.slane %v261_v15, 4  ;;  %831 = vmatprep.mubr.msk.f32.mxu0 %vm1005_vm4, %v1004_v48  ;;  %836 = vmatprep.mubr.msk.f32.mxu1 %vm1005_vm4, %v1004_v48  ;;  %v302_v53 = vand.u32 127, %v301_v52  ;;  %s728_s6 = sshll.u32 %s215_s30, 4  ;;  %s1229_s14 = scalar_lea.hbm %s1279_s4, %s822_s5  ;;  %s1231_s6 = int_to_ptr.vmem [resolvable:$true] %s728_s6 }
  0x3b   : > { %v276_v22 = vrot.slane %v275_v16, 4  ;;  %238 = vadd.xlane.f32.xlu1 %v237_v5  ;;  %232 = vadd.xlane.f32.xlu0 %v231_v10  ;;  %v1181_v57 = vshrl.u32 %v301_v52, 7  ;;  %vm312_vm5 = vcmask 130112   ;;  %vm363_vm6 = vcmask 1043456   ;;  %s715_s19 = scalar_lea.sflag [#allocation4], %s1134_s13  ;;  %s935_s20 = scalar_lea.vmem %s1231_s6, 1024 }
  0x3c   : > { %v270_v23 = vadd.f32 %v269_v19, %v268_v9  ;;  %v283_v24 = vrot.slane %v282_v20, 4  ;;  %v263_v25 = vadd.f32 %v262_v21, %v261_v15  ;;  %v307_v56 = vadd.s32 4294967288, %v302_v53  ;;  %p936_p11 = scmp.ne.s32.totalorder %s1231_s6, %s935_s20  ;;  %p1288_p12 = scmp.ne.s32.totalorder %s1284_s27, 0 }
  0x3d   : > { %v277_v26 = vadd.f32 %v276_v22, %v275_v16  ;;  %v305_v63 = vsub.s32 %v302_v53, %v1181_v57  ;;  %vm359_vm7 = vcmask 31744   ;;  %vm438_vm8 = vcmask 64512   ;;  %s1009_s22 = smov [#allocation5]  }
  0x3e   : > { %v271_v27 = vrot.slane %v270_v23, 2  ;;  %v264_v28 = vrot.slane %v263_v25, 2  ;;  %v284_v29 = vadd.f32 %v283_v24, %v282_v20  ;;  %v310_v60 = vsub.s32 %v307_v56, %v1181_v57  ;;  %p937_p13 = pnand %p936_p11, %p1288_p12 }
  0x3f   : > { %244 = vadd.xlane.f32.xlu1 %v243_v11  ;;  %v278_v30 = vrot.slane %v277_v26, 2  ;;  %241 = vadd.xlane.f32.xlu0 %v240_v12  ;;  %v625_v52 = vsub.s32 2, %v1181_v57 }
  0x40   : > { %v272_v31 = vadd.f32 %v271_v27, %v270_v23  ;;  %v265_v32 = vadd.f32 %v264_v28, %v263_v25  ;;  %v285_v33 = vrot.slane %v284_v29, 2  ;;  %p938_p4 = pneg %p937_p13 }
  0x41   : > { %v279_v34 = vadd.f32 %v278_v30, %v277_v26 }
  0x42   : > { %v273_v35 = vrot.slane %v272_v31, 1  ;;  %v266_v36 = vrot.slane %v265_v32, 1  ;;  %v286_v37 = vadd.f32 %v285_v33, %v284_v29 }
  0x43   : > { %250 = vadd.xlane.f32.xlu1 %v249_v17  ;;  %247 = vadd.xlane.f32.xlu0 %v246_v18  ;;  %v280_v38 = vrot.slane %v279_v34, 1 }
  0x44   : > { %v274_v39 = vadd.f32 %v273_v35, %v272_v31  ;;  %v267_v40 = vadd.f32 %v266_v36, %v265_v32  ;;  %v287_v41 = vrot.slane %v286_v37, 1 }
  0x45   : > { %v281_v42 = vadd.f32 %v280_v38, %v279_v34  ;;  %v216_v34 = vld [vmem:[%s1276_s1] sm:$0xff] }
  0x46   : > { %v290_v43 = vmul.f32 0.0625, %v274_v39  ;;  %v289_v44 = vmul.f32 0.0625, %v267_v40  ;;  %v288_v45 = vadd.f32 %v287_v41, %v286_v37  ;;  %v217_v38 = vld [vmem:[%s1277_s2] sm:$0xf] }
  0x47   : > { %v291_v46 = vmul.f32 0.0625, %v281_v42  ;;  %v218_v40 = vld [vmem:[%s1278_s3] sm:$0xf] }
  0x48   : > { %v352_v47 = vsel %vm341_vm1, %v290_v43, %v289_v44  ;;  %v292_v49 = vmul.f32 0.0625, %v288_v45 }
  0x49   : > { %v353_v50 = vsel %vm343_vm2, %v291_v46, %v352_v47  ;;  %v614_v47 = vsub.s32 1, %v1181_v57 }
  0x4a   : > { %v354_v51 = vsel %vm345_vm3, %v292_v49, %v353_v50 }
  0x59   : > { %355 = vrot.lane.b32.xlu0 %v354_v51, %s1006_s26  ;;  %s939_s26 = sshll.u32 %s1009_s22, 4  ;;  %s940_s26 = int_to_ptr.vmem [resolvable:$false] %s939_s26 }
  0x5a   : > { %s941_s8 = scalar_lea.vmem %s940_s26, 2048  ;;  %p942_p5 = scmp.lt.s32.totalorder %s1231_s6, %s940_s26 }
  0x5b   : > { %p943_p7 = scmp.lt.s32.totalorder %s941_s8, %s935_s20 }
  0x5d   : > { %p944_p8 = por %p943_p7, %p942_p5 }
  0x5f   : > { %p945_p10 = pnand %p944_p8, %p938_p4 }
  0xc0   : > { %v236_v54 = vpop.xlane.xlu1 %235  ;;  %v230_v55 = vpop.xlane.xlu0 %229 }
  0xc1   : > { %v255_v3 = vmul.f32 0.0625, %v236_v54  ;;  %v253_v4 = vmul.f32 0.0625, %v230_v55  ;;  %v636_v54 = vsub.s32 3, %v1181_v57 }
  0xc3   : > { %v317_v16 = vrot.slane %v255_v3, %v305_v63  ;;  %v306_v17 = vrot.slane %v253_v4, %v305_v63 }
  0xc4   : > { %v239_v58 = vpop.xlane.xlu1 %238  ;;  %v233_v59 = vpop.xlane.xlu0 %232 }
  0xc5   : > { %v256_v61 = vmul.f32 0.0625, %v239_v58  ;;  %v254_v62 = vmul.f32 0.0625, %v233_v59 }
  0xc7   : > { %v321_v10 = vrot.slane %v256_v61, %v310_v60  ;;  %v311_v11 = vrot.slane %v254_v62, %v310_v60  ;;  %v1008_v62 = vmov 1966171168  }
  0xc8   : > { %v245_v5 = vpop.xlane.xlu1 %244  ;;  %v242_v9 = vpop.xlane.xlu0 %241 }
  0xc9   : > { %v258_v12 = vmul.f32 0.0625, %v245_v5  ;;  %v257_v15 = vmul.f32 0.0625, %v242_v9  ;;  %v322_v22 = vsel %vm312_vm5, %v321_v10, %v317_v16  ;;  %v313_v23 = vsel %vm312_vm5, %v311_v11, %v306_v17 }
  0xca   : > { %v342_v30 = vsel %vm341_vm1, %v322_v22, %v313_v23 }
  0xcb   : > { %v330_v18 = vrot.slane %v258_v12, %v310_v60  ;;  %v326_v19 = vrot.slane %v257_v15, %v305_v63 }
  0xcc   : > { %v251_v20 = vpop.xlane.xlu1 %250  ;;  %v248_v21 = vpop.xlane.xlu0 %247 }
  0xcd   : > { %v260_v24 = vmul.f32 0.0625, %v251_v20  ;;  %v259_v25 = vmul.f32 0.0625, %v248_v21  ;;  %v331_v26 = vsel %vm312_vm5, %v330_v18, %v326_v19 }
  0xce   : > { %v344_v32 = vsel %vm343_vm2, %v331_v26, %v342_v30 }
  0xcf   : > { %v339_v27 = vrot.slane %v260_v24, %v310_v60  ;;  %v335_v28 = vrot.slane %v259_v25, %v305_v63  ;;  %v655_v63 = vunpack.c.l.s4 %v1008_v62 }
  0xd0   : > { %v356_v29 = vpop.permute.xlu0 %355 }
  0xd1   : > { %v340_v31 = vsel %vm312_vm5, %v339_v27, %v335_v28  ;;  %v656_v3 = vunpack.c.0.s8 %v655_v63 }
  0xd2   : > { %v346_v33 = vsel %vm345_vm3, %v340_v31, %v344_v32 }
  0xd3   : > { %v358_v35 = vsel %vm227_vm0, %v346_v33, %v356_v29  ;;  %v659_v4 = vsub.s32 %v656_v3, %v1181_v57 }
  0xd4   : > { %830 = vmatpush3.msk.msra.mxu0 %vm363_vm6, %v358_v35 }
  0xd5   : > { %832 = vmatmul.mubr.msk.f32.vlgmr.msra.gmra.mxu0 %vm359_vm7, %v216_v34  ;;  %839 = vmatprep.subr.mxu0 %v1004_v48 }
  0xd6   : > { %841 = vmatprep.mubr.msk.f32.mxu0 %vm1005_vm4, %v1004_v48  ;;  %v603_v48 = vsub.s32 0, %v1181_v57 }
 0x195   : > { %v433_v36 = vpop.f32.mrf.mxu0 }
 0x196   : > { %v437_v37 = vmax.f32 %v433_v36, 0.0 }
 0x197   : > { %v833_v39 = vpop.f32.mrf.mxu0 }
 0x198   : > { %519 = vrot.lane.b32.xlu1 %v437_v37, %s1007_s23  ;;  %835 = vmatpush3.msra.mxu1 %v437_v37 }
 0x199   : > { %837 = vmatmul.mubr.msk.f32.vlgmr.msra.gmra.mxu1 %vm438_vm8, %v217_v38 }
 0x20a   : > { %v520_v41 = vpop.permute.xlu1 %519 }
 0x20b   : > { %840 = vmatpush3.msra.mxu0 %v520_v41 }
 0x20c   : > { %842 = vmatmul.mubr.msk.f32.vlgmr.msra.gmra.mxu0 %vm438_vm8, %v218_v40 }
 0x259   : > { %v508_v42 = vpop.f32.mrf.mxu1 }
 0x25a   : > { %v813_v43 = vmul.f32 -1.442695, %v508_v42 }
 0x25b   : > { %v838_v44 = vpop.f32.mrf.mxu1 }
 0x25c   : > { %899 = vpow2.f32 %v813_v43 }
 0x269   : > { %v900_v45 = vpop.eup %899 }
 0x26a   : > { %v515_v46 = vadd.f32 1.0, %v900_v45 }
 0x26c   : > { %901 = vrcp.f32 %v515_v46 }
 0x279   : > { %v902_v49 = vpop.eup %901 }
 0x27a   : > { %v615_v50 = vrot.slane %v902_v49, %v614_v47  ;;  %v604_v51 = vrot.slane %v902_v49, %v603_v48  ;;  %v626_v53 = vrot.slane %v902_v49, %v625_v52  ;;  %v637_v55 = vrot.slane %v902_v49, %v636_v54 }
 0x27c   : > { %617 = vbcast.lane.b32.xlu0 %v615_v50, 256  ;;  %606 = vbcast.lane.b32.xlu1 %v604_v51, 256 }
 0x280   : > { %628 = vbcast.lane.b32.xlu0 %v626_v53, 256  ;;  %610 = vbcast.lane.b32.xlu1 %v604_v51, 264 }
 0x284   : > { %639 = vbcast.lane.b32.xlu0 %v637_v55, 256  ;;  %621 = vbcast.lane.b32.xlu1 %v615_v50, 264 }
 0x288   : > { %632 = vbcast.lane.b32.xlu1 %v626_v53, 264 }
 0x28c   : > { %643 = vbcast.lane.b32.xlu1 %v637_v55, 264 }
 0x2cc   : > { %v591_v56 = vpop.f32.mrf.mxu0 }
 0x2cd   : > { %v815_v58 = vmul.f32 -1.442695, %v591_v56 }
 0x2ce   : > { %v843_v59 = vpop.f32.mrf.mxu0 }
 0x2cf   : > { %903 = vpow2.f32 %v815_v58 }
 0x2dc   : > { %v904_v60 = vpop.eup %903 }
 0x2dd   : > { %v598_v61 = vadd.f32 1.0, %v904_v60 }
 0x2df   : > { %905 = vrcp.f32 %v598_v61 }
 0x2ec   : > { %v906_v5 = vpop.eup %905 }
 0x2ed   : > { %v660_v9 = vrot.slane %v906_v5, %v659_v4 }
 0x2ee   : > { %v618_v10 = vpop.permute.xlu0 %617  ;;  %v607_v11 = vpop.permute.xlu1 %606 }
 0x2ef   : > { %v661_v12 = vcombine.high %v660_v9, %v660_v9  ;;  %v668_v15 = vrot.slane %v660_v9, %v659_v4  ;;  %v645_v17 = vmul.f32 %v607_v11, %v1146_v1  ;;  %v647_v20 = vmul.f32 %v618_v10, %v1144_v0 }
 0x2f1   : > { %v675_v16 = vrot.slane %v661_v12, %v659_v4  ;;  %v681_v18 = vrot.slane %v668_v15, %v603_v48  ;;  %v676_v19 = vcombine.high %v668_v15, %v668_v15 }
 0x2f2   : > { %v629_v21 = vpop.permute.xlu0 %628  ;;  %v611_v22 = vpop.permute.xlu1 %610 }
 0x2f3   : > { %v685_v23 = vrot.slane %v675_v16, %v603_v48  ;;  %v698_v24 = vmul.f32 %v681_v18, %v645_v17  ;;  %v649_v57 = vmul.f32 %v629_v21, %v1160_v8  ;;  %v689_v25 = vrot.slane %v676_v19, %v603_v48 }
 0x2f4   : > { %v646_v26 = vmul.f32 %v611_v22, %v1156_v6  ;;  %v677_v27 = vcombine.high %v675_v16, %v675_v16 }
 0x2f5   : > { %v700_v28 = vmul.f32 %v685_v23, %v647_v20  ;;  %706 = vst.msk [vmem:[%s215_s30] sm:$0xff] %vm227_vm0, %v698_v24  ;;  %v702_v1 = vmul.f32 %v689_v25, %v649_v57 }
 0x2f6   : > { %v699_v29 = vmul.f32 %v681_v18, %v646_v26  ;;  %v640_v30 = vpop.permute.xlu0 %639  ;;  %v693_v0 = vrot.slane %v677_v27, %v603_v48  ;;  %v622_v31 = vpop.permute.xlu1 %621 }
 0x2f7   : > { %708 = vst.msk [vmem:[%s215_s30 + $0x10] sm:$0xff] %vm227_vm0, %v700_v28  ;;  %710 = vst.msk [vmem:[%s215_s30 + $0x20] sm:$0xff] %vm227_vm0, %v702_v1  ;;  %v651_v8 = vmul.f32 %v640_v30, %v1170_v14  ;;  %v648_v6 = vmul.f32 %v622_v31, %v1148_v2 }
 0x2f8   : > { %707 = vst.msk [vmem:[%s215_s30 + $0x8] sm:$0xff] %vm227_vm0, %v699_v29 }
 0x2f9   : > { %v704_v32 = vmul.f32 %v693_v0, %v651_v8  ;;  %v701_v33 = vmul.f32 %v685_v23, %v648_v6 }
 0x2fa   : > { %v633_v34 = vpop.permute.xlu1 %632 }
 0x2fb   : > { %712 = vst.msk [vmem:[%s215_s30 + $0x30] sm:$0xff] %vm227_vm0, %v704_v32  ;;  %709 = vst.msk [vmem:[%s215_s30 + $0x18] sm:$0xff] %vm227_vm0, %v701_v33  ;;  %v650_v35 = vmul.f32 %v633_v34, %v1158_v7 }
 0x2fd   : > { %v703_v36 = vmul.f32 %v689_v25, %v650_v35 }
 0x2fe   : > { %v644_v37 = vpop.permute.xlu1 %643 }
 0x2ff   : > { %711 = vst.msk [vmem:[%s215_s30 + $0x28] sm:$0xff] %vm227_vm0, %v703_v36  ;;  %v652_v2 = vmul.f32 %v644_v37, %v1168_v13 }
 0x301   : > { %v705_v14 = vmul.f32 %v693_v0, %v652_v2 }
 0x303   : > { %713 = vst.msk [vmem:[%s215_s30 + $0x38] sm:$0xff] %vm227_vm0, %v705_v14 }
 0x304   : > { %948 = shalt.err (!%p945_p10)
}
 0x305   : > { %s949_s10 = scalar_lea.hbm %s1229_s14, 1024  ;;  %s953_s23 = scalar_lea.hbm %s1279_s4, 2048 }
 0x306   : > { %p950_p0 = scmp.ne.s32.totalorder %s1229_s14, %s949_s10  ;;  %p954_p1 = scmp.lt.s32.totalorder %s1229_s14, %s1279_s4 }
 0x307   : > { %p955_p3 = scmp.lt.s32.totalorder %s953_s23, %s949_s10 }
 0x308   : > { %p951_p2 = pnand %p950_p0, %p1288_p12 }
 0x309   : > { %p956_p6 = por %p955_p3, %p954_p1 }
 0x30a   : > { %p952_p9 = pneg %p951_p2 }
 0x30c   : > { %p957_p11 = pnand %p956_p6, %p952_p9 }
 0x30e   : > { %960 = shalt.err (!%p957_p11)
}
 0x30f   : > { %s1010_s30 = smov 128   ;;  %s1011_s5 = smov 8  }
 0x310   : > { %846 = dma.vmem_to_hbm [thread:$0]  (%p1288_p12), %s1231_s6, 1024, %s1229_s14, %s715_s19, %s1010_s30, %s1010_s30, %s1011_s5  }
 0x311 PF: > { %s743_s7 = sand.u32 1, %s987_s15   ;;  %p1289_p13 = scmp.ne.s32.totalorder %s1285_s28, 0 }
 0x312   : > { %p1290_p4 = scmp.ge.s32.totalorder %s999_s18, 2  ;;  %s744_s9 = scalar_lea.sflag [#allocation4], %s743_s7 }
 0x314   : > { %p853_p5 = pnand %p1290_p4, %p1289_p13 }
 0x316   : > { %p854_p7 = pneg %p853_p5 }
 0x318   : > { %982 = dma.done.wait (%p854_p7), %s744_s9, 1024  }
 0x319   : > { %984 = vsyncadd (%p854_p7), %s744_s9, 4294966272  ;;  %p17_p8 = scmp.ge.s32.totalorder %s1062_s21, 4   ;;  %s1291_s15 = smov %s991_s16 }
 0x31a   : > { %s1292_s16 = smov %s995_s17  ;;  %s1293_s17 = smov %s1074_s24 }
 0x31b   : > { %s1294_s18 = smov %s1062_s21  ;;  %19 = sbr.rel (!%p17_p8) target bundleno = 5 (0x5), region = 81 }
 0x320   :  { %749 = vsyncpa [#allocation3], 1 }
 0x321   :  { %751 = vsyncpa [#allocation3 + $0x1], 1 }
 0x322   :  { %752 = vsyncpa [#allocation4], 1 }
 0x323   :  { %754 = vsyncpa [#allocation4 + $0x1], 1 }

</bundles_post_ra>
